<compile_context>
chip_gen: v5e
topology: v5e:2x2
jax: 0.10.0
libtpu: 0.0.40
codegen_flags: <defaults>
</compile_context>

<pallas_src>
import functools

import jax
import jax.numpy as jnp
from jax.experimental import pallas as pl
from jax.experimental.pallas import tpu as pltpu


def _round_up(x, m):
    return (x + m - 1) // m * m


def _cdiv(a, b):
    return -(-a // b)


def _padded_dims(dims):
    # Lane-pad every feature width to a multiple of 128.  Widths in (128, 256]
    # land on 256 (full 256x256 MXU tile occupancy on v6e/v7x); <=128 stays at
    # 128, which is already optimal on v5e's 128x128 MXU.
    return tuple(_round_up(d, 128) for d in dims)


# ---------------------------------------------------------------------------
# Kernel
# ---------------------------------------------------------------------------
def _mlp_kernel(x_ref, *refs, ln_flags, relu_flags, out_tanh,
                out_actual, out_padded, eps=1e-5):
    """Fused MLP chunk on one batch tile.

    refs = [W0, b0, (g0, beta0), W1, b1, ..., out_ref].
    Weights are (in, out), zero-padded on the lane dims; biases / gamma / beta
    are zero-padded (1, out) rows, so padded lanes of every intermediate stay
    exactly 0.  Weights may be bf16 (MXU operands); everything else is f32.
    """
    o_ref = refs[-1]
    params = refs[:-1]
    num_layers = len(ln_flags)

    h = x_ref[...].astype(jnp.float32)
    idx = 0
    for i in range(num_layers):
        w = params[idx][...]
        b = params[idx + 1][...].astype(jnp.float32)
        idx += 2
        # MXU matmul: bf16 (or f32) operands, f32 accumulation.
        h = jnp.dot(h.astype(w.dtype), w,
                    preferred_element_type=jnp.float32) + b
        if ln_flags[i]:
            g = params[idx][...].astype(jnp.float32)
            be = params[idx + 1][...].astype(jnp.float32)
            idx += 2
            d_act = out_actual[i]
            d_pad = out_padded[i]
            inv_n = 1.0 / d_act
            # Padded lanes of h are exactly 0 -> unmasked sum / d_act is the
            # true mean over the actual features.
            mean = jnp.sum(h, axis=-1, keepdims=True) * inv_n
            centered = h - mean
            ssq = jnp.sum(centered * centered, axis=-1, keepdims=True)
            if d_pad != d_act:
                # Padded lanes contribute (d_pad - d_act) * mean^2 to the
                # centered sum-of-squares; correct analytically (no lane mask).
                ssq = ssq - (d_pad - d_act) * (mean * mean)
            # Fold gamma * rsqrt(var + eps) into one scale.
            scale = jax.lax.rsqrt(ssq * inv_n + eps) * g
            h = centered * scale + be          # padded lanes -> 0 (g = be = 0)
        if relu_flags[i]:
            h = jnp.maximum(h, 0.0)
    if out_tanh:
        h = jnp.tanh(h)
    o_ref[...] = h.astype(o_ref.dtype)


# ---------------------------------------------------------------------------
# pallas_call wrapper (shared by the fused and per-layer paths)
# ---------------------------------------------------------------------------
def _run_mlp_call(xp, layer_params, *, ln_flags, relu_flags, out_tanh,
                  out_actual, out_padded, tile_b, out_dtype, vmem_cap):
    pb, in_width = xp.shape
    grid = (pb // tile_b,)
    flat_params = [a for lyr in layer_params for a in lyr]

    kernel = functools.partial(
        _mlp_kernel, ln_flags=ln_flags, relu_flags=relu_flags,
        out_tanh=out_tanh, out_actual=out_actual, out_padded=out_padded)

    # x / out are batch-tiled; the input's last dim is full-extent (no wrapper
    # lane padding), the output's last dim is a lane-dense multiple of 128.
    x_spec = pl.BlockSpec((tile_b, in_width), lambda i: (i, 0))
    out_spec = pl.BlockSpec((tile_b, out_padded[-1]), lambda i: (i, 0))
    out_shape = jax.ShapeDtypeStruct((pb, out_padded[-1]), out_dtype)

    out_itemsize = jnp.dtype(out_dtype).itemsize
    param_bytes = sum(int(a.size) * a.dtype.itemsize for a in flat_params)
    io_bytes = 2 * tile_b * (in_width * xp.dtype.itemsize
                             + out_padded[-1] * out_itemsize)
    act_bytes = 6 * tile_b * max(out_padded) * 4       # live f32 intermediates

    in_widths = (in_width,) + tuple(out_padded[:-1])
    flops = 2 * pb * sum(iw * ow for iw, ow in zip(in_widths, out_padded))
    transcendentals = pb * ((out_padded[-1] if out_tanh else 0) + sum(ln_flags))
    bytes_accessed = (int(xp.size) * xp.dtype.itemsize + param_bytes
                      + pb * out_padded[-1] * out_itemsize)
    cost = pl.CostEstimate(flops=flops, transcendentals=transcendentals,
                           bytes_accessed=bytes_accessed)

    def build_and_run(param_pipeline_mode, param_buf_factor):
        if param_pipeline_mode is None:
            param_specs = [pl.BlockSpec(p.shape, lambda i: (0, 0))
                           for p in flat_params]
        else:
            param_specs = [pl.BlockSpec(p.shape, lambda i: (0, 0),
                                        pipeline_mode=param_pipeline_mode)
                           for p in flat_params]
        need = io_bytes + param_buf_factor * param_bytes + act_bytes + (2 << 20)
        vmem_limit = int(min(max(need, 16 << 20), (vmem_cap * 3) // 4))
        return pl.pallas_call(
            kernel,
            out_shape=out_shape,
            grid=grid,
            in_specs=[x_spec] + param_specs,
            out_specs=out_spec,
            compiler_params=pltpu.CompilerParams(
                dimension_semantics=("parallel",),
                vmem_limit_bytes=vmem_limit),
            cost_estimate=cost,
        )(xp, *flat_params)

    try:
        # Constant-index params never re-DMA: a single buffer saves VMEM
        # (matters most inside v7x's 64 MiB per-TensorCore budget).
        return build_and_run(pl.Buffered(1), 1)
    except Exception:
        # Fallback for Pallas versions that reject buffer_count=1.
        return build_and_run(None, 2)


# ---------------------------------------------------------------------------
# Forward pass
# ---------------------------------------------------------------------------
def fc_network_forward(x, layers, dims, use_layer_norm=False,
                       output_activation=None, max_tile_b=1024,
                       resident_budget_bytes=None):
    """Forward pass.  `layers` must come from prepare_fc_network_params."""
    num_layers = len(dims) - 1
    batch, in_dim = x.shape
    assert in_dim == dims[0]
    padded = _padded_dims(dims)
    out_dim = dims[-1]
    out_tanh = (output_activation == "tanh")

    # Batch tiling: tile_b is a multiple of 16 (bf16 sublane packing) chosen to
    # minimise tail padding; only rows are padded, never lanes.
    n_tiles = max(1, _cdiv(batch, max_tile_b))
    tile_b = _round_up(_cdiv(batch, n_tiles), 16)
    pb = n_tiles * tile_b
    xp = x if pb == batch else jnp.zeros((pb, in_dim), x.dtype).at[:batch].set(x)

    try:
        vmem_cap = int(pltpu.get_tpu_info().vmem_capacity_bytes)
    except Exception:
        vmem_cap = 64 << 20                       # conservative (v7x per-TC)
    vmem_cap = min(vmem_cap, 128 << 20)
    if resident_budget_bytes is None:
        # TODO(synk): confirm get_tpu_info() reports per-TensorCore (not
        # per-chip) capacity on 2-TC parts; until then cap the all-resident
        # fused path at ~48 MiB so megacore batch-sharding never spills.
        resident_budget_bytes = min((vmem_cap * 3) // 4, 48 << 20)

    param_bytes = sum(int(a.size) * a.dtype.itemsize
                      for lyr in layers for a in lyr)
    fused_need = (param_bytes + 6 * tile_b * max(padded[1:]) * 4
                  + 2 * tile_b * (in_dim + padded[-1]) * 4 + (2 << 20))

    if fused_need <= resident_budget_bytes:
        out_padded = _run_mlp_call(
            xp, layers,
            ln_flags=tuple(use_layer_norm and i < num_layers - 1
                           for i in range(num_layers)),
            relu_flags=tuple(i < num_layers - 1 for i in range(num_layers)),
            out_tanh=out_tanh,
            out_actual=tuple(dims[1:]),
            out_padded=tuple(padded[1:]),
            tile_b=tile_b, out_dtype=x.dtype, vmem_cap=vmem_cap)
    else:
        # Per-layer fallback: weights too large to hold resident (v7x 64 MiB
        # per TC).  Intermediates are bf16 -- the fused path casts to bf16
        # right before each matmul anyway, so this is numerically identical.
        # TODO(synk): layers wider than ~4k also need K/N tiling inside each
        # per-layer call (emit_pipeline over the contraction dim).
        h = xp
        for i in range(num_layers):
            last = (i == num_layers - 1)
            h = _run_mlp_call(
                h, [layers[i]],
                ln_flags=(use_layer_norm and not last,),
                relu_flags=(not last,),
                out_tanh=(out_tanh and last),
                out_actual=(dims[i + 1],),
                out_padded=(padded[i + 1],),
                tile_b=tile_b,
                out_dtype=(x.dtype if last else jnp.bfloat16),
                vmem_cap=vmem_cap)
        out_padded = h

    return out_padded[:batch, :out_dim]


# ---------------------------------------------------------------------------
# Parameter creation / preparation
# ---------------------------------------------------------------------------
def _orthogonal(key, rows, cols, gain):
    """Deterministic orthogonal init (nn.init.orthogonal_ semantics)."""
    flat = jax.random.normal(key, (max(rows, cols), min(rows, cols)),
                             dtype=jnp.float32)
    q, r = jnp.linalg.qr(flat)
    d = jnp.diagonal(r)
    q = q * jnp.where(d >= 0, 1.0, -1.0)
    if rows < cols:
        q = q.T
    return gain * q[:rows, :cols]


def make_fc_network_params(key, dims, use_layer_norm):
    """Flat list of UNPADDED params: [W0(in,out), b0(1,out), (g0, beta0), ...]."""
    params = []
    num_layers = len(dims) - 1
    for i in range(num_layers):
        key, sub = jax.random.split(key)
        w_pt = _orthogonal(sub, dims[i + 1], dims[i], gain=1.414)  # (out, in)
        params.append(w_pt.T)                                      # (in, out)
        params.append(jnp.zeros((1, dims[i + 1]), jnp.float32))    # bias
        if i < num_layers - 1 and use_layer_norm:
            params.append(jnp.ones((1, dims[i + 1]), jnp.float32))   # gamma
            params.append(jnp.zeros((1, dims[i + 1]), jnp.float32))  # beta
    return params


def prepare_fc_network_params(params, dims, use_layer_norm,
                              weights_dtype=jnp.bfloat16):
    """Pad (lane-dense) and cast parameters ONCE; returns per-layer tuples.

    Call at parameter-creation time (not per forward): removes the per-step
    pad/cast HBM traffic flagged in the review.
    """
    padded = _padded_dims(dims)
    num_layers = len(dims) - 1
    layers = []
    idx = 0
    for i in range(num_layers):
        w, b = params[idx], params[idx + 1]
        idx += 2
        in_p = dims[0] if i == 0 else padded[i]     # first layer: x unpadded
        wp = jnp.zeros((in_p, padded[i + 1]), jnp.float32)
        wp = wp.at[:dims[i], :dims[i + 1]].set(w.astype(jnp.float32))
        wp = wp.astype(weights_dtype)
        bp = jnp.zeros((1, padded[i + 1]), jnp.float32)
        bp = bp.at[:, :dims[i + 1]].set(b.astype(jnp.float32).reshape(1, -1))
        lyr = [wp, bp]
        if i < num_layers - 1 and use_layer_norm:
            g, be = params[idx], params[idx + 1]
            idx += 2
            gp = jnp.zeros((1, padded[i + 1]), jnp.float32)
            gp = gp.at[:, :dims[i + 1]].set(g.astype(jnp.float32).reshape(1, -1))
            bep = jnp.zeros((1, padded[i + 1]), jnp.float32)
            bep = bep.at[:, :dims[i + 1]].set(be.astype(jnp.float32).reshape(1, -1))
            lyr += [gp, bep]
        layers.append(tuple(lyr))
    return layers


# ---------------------------------------------------------------------------
# Pure-JAX reference (mirrors the PyTorch nn.Sequential)
# ---------------------------------------------------------------------------
def fc_network_reference(x, params, dims, use_layer_norm=False,
                         output_activation=None, matmul_dtype=jnp.float32,
                         eps=1e-5):
    num_layers = len(dims) - 1
    h = x.astype(jnp.float32)
    idx = 0
    for i in range(num_layers):
        w, b = params[idx], params[idx + 1]
        idx += 2
        h = jnp.dot(h.astype(matmul_dtype), w.astype(matmul_dtype),
                    preferred_element_type=jnp.float32) + b.astype(jnp.float32)
        if i < num_layers - 1:
            if use_layer_norm:
                g, be = params[idx], params[idx + 1]
                idx += 2
                mean = jnp.mean(h, axis=-1, keepdims=True)
                var = jnp.mean((h - mean) ** 2, axis=-1, keepdims=True)
                h = (h - mean) * jax.lax.rsqrt(var + eps) * g + be
            h = jnp.maximum(h, 0.0)
    if output_activation == "tanh":
        h = jnp.tanh(h)
    return h.astype(x.dtype)


if __name__ == "__main__":
    # TD3-actor-like config: obs_dim=16 -> hidden 64,64 -> action_dim=8,
    # LayerNorm + Tanh output (exercises every branch of FCNetwork).
    dims = (16, 64, 64, 8)
    batch = 2
    key = jax.random.PRNGKey(0)
    kx, kp = jax.random.split(key)
    x = jax.random.normal(kx, (batch, dims[0]), dtype=jnp.float32)
    raw = make_fc_network_params(kp, dims, use_layer_norm=True)

    ref_f32 = fc_network_reference(x, raw, dims, True, "tanh")
    ref_bf16 = fc_network_reference(x, raw, dims, True, "tanh",
                                    matmul_dtype=jnp.bfloat16)

    # --- A: fused kernel, bf16 weights (perf path) ---
    layers_bf16 = prepare_fc_network_params(raw, dims, True, jnp.bfloat16)
    out = jax.block_until_ready(
        fc_network_forward(x, layers_bf16, dims, True, "tanh"))
    assert out.shape == (batch, dims[-1])
    assert jnp.allclose(out, ref_bf16, atol=1e-3, rtol=1e-3), (
        f"bf16-matched max err {jnp.max(jnp.abs(out - ref_bf16))}")
    assert jnp.allclose(out, ref_f32, atol=3e-2, rtol=3e-2), (
        f"f32 max err {jnp.max(jnp.abs(out - ref_f32))}")

    # --- A2: fused kernel, f32 weights -> strict semantic check ---
    layers_f32 = prepare_fc_network_params(raw, dims, True, jnp.float32)
    out32 = jax.block_until_ready(
        fc_network_forward(x, layers_f32, dims, True, "tanh"))
    assert jnp.allclose(out32, ref_f32, atol=1e-5, rtol=1e-5), (
        f"f32-strict max err {jnp.max(jnp.abs(out32 - ref_f32))}")

    # --- B: no-LN / no-activation, batch=600, multi-step pipelined grid ---
    dims2 = (16, 64, 64, 8)
    batch2 = 600
    kx2, kp2 = jax.random.split(kp)
    x2 = jax.random.normal(kx2, (batch2, dims2[0]), dtype=jnp.float32)
    raw2 = make_fc_network_params(kp2, dims2, use_layer_norm=False)
    layers2 = prepare_fc_network_params(raw2, dims2, False, jnp.bfloat16)
    out2 = jax.block_until_ready(
        fc_network_forward(x2, layers2, dims2, False, None, max_tile_b=256))
    ref2 = fc_network_reference(x2, raw2, dims2, False, None,
                                matmul_dtype=jnp.bfloat16)
    assert out2.shape == (batch2, dims2[-1])
    assert jnp.allclose(out2, ref2, atol=1e-3, rtol=1e-3), (
        f"batch600 max err {jnp.max(jnp.abs(out2 - ref2))}")

    # --- C: force the per-layer (non-resident) fallback path ---
    out3 = jax.block_until_ready(
        fc_network_forward(x, layers_bf16, dims, True, "tanh",
                           resident_budget_bytes=0))
    assert jnp.allclose(out3, ref_bf16, atol=1e-3, rtol=1e-3), (
        f"per-layer max err {jnp.max(jnp.abs(out3 - ref_bf16))}")

    print("KERNEL_OK")
</pallas_src>

<mosaic_0001>
module attributes {stable_mosaic.version = 11 : i64} {
  func.func @_mlp_kernel(%arg0: i32, %arg1: memref<16x16xf32, #tpu.memory_space<vmem>>, %arg2: memref<16x128xbf16, #tpu.memory_space<vmem>>, %arg3: memref<1x128xf32, #tpu.memory_space<vmem>>, %arg4: memref<1x128xf32, #tpu.memory_space<vmem>>, %arg5: memref<1x128xf32, #tpu.memory_space<vmem>>, %arg6: memref<128x128xbf16, #tpu.memory_space<vmem>>, %arg7: memref<1x128xf32, #tpu.memory_space<vmem>>, %arg8: memref<1x128xf32, #tpu.memory_space<vmem>>, %arg9: memref<1x128xf32, #tpu.memory_space<vmem>>, %arg10: memref<128x128xbf16, #tpu.memory_space<vmem>>, %arg11: memref<1x128xf32, #tpu.memory_space<vmem>>, %arg12: memref<16x128xf32, #tpu.memory_space<vmem>>) attributes {dimension_semantics = [#tpu.dimension_semantics<parallel>], iteration_bounds = array<i64: 1>, scalar_prefetch = 0 : i64, scratch_operands = 0 : i64, tpu.core_type = #tpu.core_type<tc>, window_params = [{transform_indices = @transform_0, window_bounds = array<i64: 16, 16>}, {pipeline_mode = #tpu.pipeline_mode<synchronous>, transform_indices = @transform_1, window_bounds = array<i64: 16, 128>}, {pipeline_mode = #tpu.pipeline_mode<synchronous>, transform_indices = @transform_2, window_bounds = array<i64: 1, 128>}, {pipeline_mode = #tpu.pipeline_mode<synchronous>, transform_indices = @transform_3, window_bounds = array<i64: 1, 128>}, {pipeline_mode = #tpu.pipeline_mode<synchronous>, transform_indices = @transform_4, window_bounds = array<i64: 1, 128>}, {pipeline_mode = #tpu.pipeline_mode<synchronous>, transform_indices = @transform_5, window_bounds = array<i64: 128, 128>}, {pipeline_mode = #tpu.pipeline_mode<synchronous>, transform_indices = @transform_6, window_bounds = array<i64: 1, 128>}, {pipeline_mode = #tpu.pipeline_mode<synchronous>, transform_indices = @transform_7, window_bounds = array<i64: 1, 128>}, {pipeline_mode = #tpu.pipeline_mode<synchronous>, transform_indices = @transform_8, window_bounds = array<i64: 1, 128>}, {pipeline_mode = #tpu.pipeline_mode<synchronous>, transform_indices = @transform_9, window_bounds = array<i64: 128, 128>}, {pipeline_mode = #tpu.pipeline_mode<synchronous>, transform_indices = @transform_10, window_bounds = array<i64: 1, 128>}, {transform_indices = @transform_11, window_bounds = array<i64: 16, 128>}]} {
    %c0 = arith.constant 0 : index
    %c0_0 = arith.constant 0 : index
    %0 = vector.load %arg1[%c0, %c0_0] : memref<16x16xf32, #tpu.memory_space<vmem>>, vector<16x16xf32>
    %c0_1 = arith.constant 0 : index
    %c0_2 = arith.constant 0 : index
    %1 = vector.load %arg2[%c0_1, %c0_2] : memref<16x128xbf16, #tpu.memory_space<vmem>>, vector<16x128xbf16>
    %c0_3 = arith.constant 0 : index
    %c0_4 = arith.constant 0 : index
    %2 = vector.load %arg3[%c0_3, %c0_4] : memref<1x128xf32, #tpu.memory_space<vmem>>, vector<1x128xf32>
    %3 = arith.truncf %0 : vector<16x16xf32> to vector<16x16xbf16>
    %cst = arith.constant dense<0.000000e+00> : vector<16x128xf32>
    %4 = tpu.matmul %3, %1, %cst {dimension_numbers = #tpu.dot_dimension_numbers<[1], [0], [0], [1], [0, 0, 1, 1], [], []>} : vector<16x16xbf16>, vector<16x128xbf16>, vector<16x128xf32> -> vector<16x128xf32>
    %5 = vector.broadcast %2 : vector<1x128xf32> to vector<16x128xf32>
    %6 = arith.addf %4, %5 : vector<16x128xf32>
    %c0_5 = arith.constant 0 : index
    %c0_6 = arith.constant 0 : index
    %7 = vector.load %arg4[%c0_5, %c0_6] : memref<1x128xf32, #tpu.memory_space<vmem>>, vector<1x128xf32>
    %c0_7 = arith.constant 0 : index
    %c0_8 = arith.constant 0 : index
    %8 = vector.load %arg5[%c0_7, %c0_8] : memref<1x128xf32, #tpu.memory_space<vmem>>, vector<1x128xf32>
    %cst_9 = arith.constant dense<0.000000e+00> : vector<16xf32>
    %9 = vector.multi_reduction <add>, %6, %cst_9 [1] : vector<16x128xf32> to vector<16xf32>
    %10 = vector.shape_cast %9 : vector<16xf32> to vector<16x1xf32>
    %cst_10 = arith.constant 1.562500e-02 : f32
    %11 = vector.broadcast %cst_10 : f32 to vector<16x1xf32>
    %12 = arith.mulf %10, %11 : vector<16x1xf32>
    %13 = vector.broadcast %12 : vector<16x1xf32> to vector<16x128xf32>
    %14 = arith.subf %6, %13 : vector<16x128xf32>
    %15 = arith.mulf %14, %14 : vector<16x128xf32>
    %cst_11 = arith.constant dense<0.000000e+00> : vector<16xf32>
    %16 = vector.multi_reduction <add>, %15, %cst_11 [1] : vector<16x128xf32> to vector<16xf32>
    %17 = vector.shape_cast %16 : vector<16xf32> to vector<16x1xf32>
    %18 = arith.mulf %12, %12 : vector<16x1xf32>
    %cst_12 = arith.constant 6.400000e+01 : f32
    %19 = vector.broadcast %cst_12 : f32 to vector<16x1xf32>
    %20 = arith.mulf %19, %18 : vector<16x1xf32>
    %21 = arith.subf %17, %20 : vector<16x1xf32>
    %cst_13 = arith.constant 1.562500e-02 : f32
    %22 = vector.broadcast %cst_13 : f32 to vector<16x1xf32>
    %23 = arith.mulf %21, %22 : vector<16x1xf32>
    %cst_14 = arith.constant 9.99999974E-6 : f32
    %24 = vector.broadcast %cst_14 : f32 to vector<16x1xf32>
    %25 = arith.addf %23, %24 : vector<16x1xf32>
    %26 = math.rsqrt %25 : vector<16x1xf32>
    %27 = vector.broadcast %26 : vector<16x1xf32> to vector<16x128xf32>
    %28 = vector.broadcast %7 : vector<1x128xf32> to vector<16x128xf32>
    %29 = arith.mulf %27, %28 : vector<16x128xf32>
    %30 = arith.mulf %14, %29 : vector<16x128xf32>
    %31 = vector.broadcast %8 : vector<1x128xf32> to vector<16x128xf32>
    %32 = arith.addf %30, %31 : vector<16x128xf32>
    %cst_15 = arith.constant 0.000000e+00 : f32
    %33 = vector.broadcast %cst_15 : f32 to vector<16x128xf32>
    %34 = arith.maximumf %32, %33 : vector<16x128xf32>
    %c0_16 = arith.constant 0 : index
    %c0_17 = arith.constant 0 : index
    %35 = vector.load %arg6[%c0_16, %c0_17] : memref<128x128xbf16, #tpu.memory_space<vmem>>, vector<128x128xbf16>
    %c0_18 = arith.constant 0 : index
    %c0_19 = arith.constant 0 : index
    %36 = vector.load %arg7[%c0_18, %c0_19] : memref<1x128xf32, #tpu.memory_space<vmem>>, vector<1x128xf32>
    %37 = arith.truncf %34 : vector<16x128xf32> to vector<16x128xbf16>
    %cst_20 = arith.constant dense<0.000000e+00> : vector<16x128xf32>
    %38 = tpu.matmul %37, %35, %cst_20 {dimension_numbers = #tpu.dot_dimension_numbers<[1], [0], [0], [1], [0, 0, 1, 1], [], []>} : vector<16x128xbf16>, vector<128x128xbf16>, vector<16x128xf32> -> vector<16x128xf32>
    %39 = vector.broadcast %36 : vector<1x128xf32> to vector<16x128xf32>
    %40 = arith.addf %38, %39 : vector<16x128xf32>
    %c0_21 = arith.constant 0 : index
    %c0_22 = arith.constant 0 : index
    %41 = vector.load %arg8[%c0_21, %c0_22] : memref<1x128xf32, #tpu.memory_space<vmem>>, vector<1x128xf32>
    %c0_23 = arith.constant 0 : index
    %c0_24 = arith.constant 0 : index
    %42 = vector.load %arg9[%c0_23, %c0_24] : memref<1x128xf32, #tpu.memory_space<vmem>>, vector<1x128xf32>
    %cst_25 = arith.constant dense<0.000000e+00> : vector<16xf32>
    %43 = vector.multi_reduction <add>, %40, %cst_25 [1] : vector<16x128xf32> to vector<16xf32>
    %44 = vector.shape_cast %43 : vector<16xf32> to vector<16x1xf32>
    %cst_26 = arith.constant 1.562500e-02 : f32
    %45 = vector.broadcast %cst_26 : f32 to vector<16x1xf32>
    %46 = arith.mulf %44, %45 : vector<16x1xf32>
    %47 = vector.broadcast %46 : vector<16x1xf32> to vector<16x128xf32>
    %48 = arith.subf %40, %47 : vector<16x128xf32>
    %49 = arith.mulf %48, %48 : vector<16x128xf32>
    %cst_27 = arith.constant dense<0.000000e+00> : vector<16xf32>
    %50 = vector.multi_reduction <add>, %49, %cst_27 [1] : vector<16x128xf32> to vector<16xf32>
    %51 = vector.shape_cast %50 : vector<16xf32> to vector<16x1xf32>
    %52 = arith.mulf %46, %46 : vector<16x1xf32>
    %cst_28 = arith.constant 6.400000e+01 : f32
    %53 = vector.broadcast %cst_28 : f32 to vector<16x1xf32>
    %54 = arith.mulf %53, %52 : vector<16x1xf32>
    %55 = arith.subf %51, %54 : vector<16x1xf32>
    %cst_29 = arith.constant 1.562500e-02 : f32
    %56 = vector.broadcast %cst_29 : f32 to vector<16x1xf32>
    %57 = arith.mulf %55, %56 : vector<16x1xf32>
    %cst_30 = arith.constant 9.99999974E-6 : f32
    %58 = vector.broadcast %cst_30 : f32 to vector<16x1xf32>
    %59 = arith.addf %57, %58 : vector<16x1xf32>
    %60 = math.rsqrt %59 : vector<16x1xf32>
    %61 = vector.broadcast %60 : vector<16x1xf32> to vector<16x128xf32>
    %62 = vector.broadcast %41 : vector<1x128xf32> to vector<16x128xf32>
    %63 = arith.mulf %61, %62 : vector<16x128xf32>
    %64 = arith.mulf %48, %63 : vector<16x128xf32>
    %65 = vector.broadcast %42 : vector<1x128xf32> to vector<16x128xf32>
    %66 = arith.addf %64, %65 : vector<16x128xf32>
    %cst_31 = arith.constant 0.000000e+00 : f32
    %67 = vector.broadcast %cst_31 : f32 to vector<16x128xf32>
    %68 = arith.maximumf %66, %67 : vector<16x128xf32>
    %c0_32 = arith.constant 0 : index
    %c0_33 = arith.constant 0 : index
    %69 = vector.load %arg10[%c0_32, %c0_33] : memref<128x128xbf16, #tpu.memory_space<vmem>>, vector<128x128xbf16>
    %c0_34 = arith.constant 0 : index
    %c0_35 = arith.constant 0 : index
    %70 = vector.load %arg11[%c0_34, %c0_35] : memref<1x128xf32, #tpu.memory_space<vmem>>, vector<1x128xf32>
    %71 = arith.truncf %68 : vector<16x128xf32> to vector<16x128xbf16>
    %cst_36 = arith.constant dense<0.000000e+00> : vector<16x128xf32>
    %72 = tpu.matmul %71, %69, %cst_36 {dimension_numbers = #tpu.dot_dimension_numbers<[1], [0], [0], [1], [0, 0, 1, 1], [], []>} : vector<16x128xbf16>, vector<128x128xbf16>, vector<16x128xf32> -> vector<16x128xf32>
    %73 = vector.broadcast %70 : vector<1x128xf32> to vector<16x128xf32>
    %74 = arith.addf %72, %73 : vector<16x128xf32>
    %75 = math.tanh %74 : vector<16x128xf32>
    %c0_37 = arith.constant 0 : index
    %c0_38 = arith.constant 0 : index
    %76 = vector.load %arg12[%c0_37, %c0_38] : memref<16x128xf32, #tpu.memory_space<vmem>>, vector<16x128xf32>
    tpu.vector_store %arg12[%c0_37, %c0_38], %75 {strides = array<i32>} : memref<16x128xf32, #tpu.memory_space<vmem>>, vector<16x128xf32>,
    return
  }
  func.func @transform_0(%arg0: i32) -> (i32, i32) {
    %c0_i32 = arith.constant 0 : i32
    %c0_i32_0 = arith.constant 0 : i32
    return %arg0, %c0_i32 : i32, i32
  }
  func.func @transform_1(%arg0: i32) -> (i32, i32) {
    %c0_i32 = arith.constant 0 : i32
    %c0_i32_0 = arith.constant 0 : i32
    %c0_i32_1 = arith.constant 0 : i32
    return %c0_i32, %c0_i32_0 : i32, i32
  }
  func.func @transform_2(%arg0: i32) -> (i32, i32) {
    %c0_i32 = arith.constant 0 : i32
    %c0_i32_0 = arith.constant 0 : i32
    %c0_i32_1 = arith.constant 0 : i32
    return %c0_i32, %c0_i32_0 : i32, i32
  }
  func.func @transform_3(%arg0: i32) -> (i32, i32) {
    %c0_i32 = arith.constant 0 : i32
    %c0_i32_0 = arith.constant 0 : i32
    %c0_i32_1 = arith.constant 0 : i32
    return %c0_i32, %c0_i32_0 : i32, i32
  }
  func.func @transform_4(%arg0: i32) -> (i32, i32) {
    %c0_i32 = arith.constant 0 : i32
    %c0_i32_0 = arith.constant 0 : i32
    %c0_i32_1 = arith.constant 0 : i32
    return %c0_i32, %c0_i32_0 : i32, i32
  }
  func.func @transform_5(%arg0: i32) -> (i32, i32) {
    %c0_i32 = arith.constant 0 : i32
    %c0_i32_0 = arith.constant 0 : i32
    %c0_i32_1 = arith.constant 0 : i32
    return %c0_i32, %c0_i32_0 : i32, i32
  }
  func.func @transform_6(%arg0: i32) -> (i32, i32) {
    %c0_i32 = arith.constant 0 : i32
    %c0_i32_0 = arith.constant 0 : i32
    %c0_i32_1 = arith.constant 0 : i32
    return %c0_i32, %c0_i32_0 : i32, i32
  }
  func.func @transform_7(%arg0: i32) -> (i32, i32) {
    %c0_i32 = arith.constant 0 : i32
    %c0_i32_0 = arith.constant 0 : i32
    %c0_i32_1 = arith.constant 0 : i32
    return %c0_i32, %c0_i32_0 : i32, i32
  }
  func.func @transform_8(%arg0: i32) -> (i32, i32) {
    %c0_i32 = arith.constant 0 : i32
    %c0_i32_0 = arith.constant 0 : i32
    %c0_i32_1 = arith.constant 0 : i32
    return %c0_i32, %c0_i32_0 : i32, i32
  }
  func.func @transform_9(%arg0: i32) -> (i32, i32) {
    %c0_i32 = arith.constant 0 : i32
    %c0_i32_0 = arith.constant 0 : i32
    %c0_i32_1 = arith.constant 0 : i32
    return %c0_i32, %c0_i32_0 : i32, i32
  }
  func.func @transform_10(%arg0: i32) -> (i32, i32) {
    %c0_i32 = arith.constant 0 : i32
    %c0_i32_0 = arith.constant 0 : i32
    %c0_i32_1 = arith.constant 0 : i32
    return %c0_i32, %c0_i32_0 : i32, i32
  }
  func.func @transform_11(%arg0: i32) -> (i32, i32) {
    %c0_i32 = arith.constant 0 : i32
    %c0_i32_0 = arith.constant 0 : i32
    return %arg0, %c0_i32 : i32, i32
  }
}

module attributes {stable_mosaic.version = 11 : i64} {
  func.func @_mlp_kernel(%arg0: i32, %arg1: memref<16x16xf32, #tpu.memory_space<vmem>>, %arg2: memref<16x128xbf16, #tpu.memory_space<vmem>>, %arg3: memref<1x128xf32, #tpu.memory_space<vmem>>, %arg4: memref<1x128xf32, #tpu.memory_space<vmem>>, %arg5: memref<1x128xf32, #tpu.memory_space<vmem>>, %arg6: memref<128x128xbf16, #tpu.memory_space<vmem>>, %arg7: memref<1x128xf32, #tpu.memory_space<vmem>>, %arg8: memref<1x128xf32, #tpu.memory_space<vmem>>, %arg9: memref<1x128xf32, #tpu.memory_space<vmem>>, %arg10: memref<128x128xbf16, #tpu.memory_space<vmem>>, %arg11: memref<1x128xf32, #tpu.memory_space<vmem>>, %arg12: memref<16x128xf32, #tpu.memory_space<vmem>>) attributes {dimension_semantics = [#tpu.dimension_semantics<parallel>], iteration_bounds = array<i64: 1>, scalar_prefetch = 0 : i64, scratch_operands = 0 : i64, tpu.core_type = #tpu.core_type<tc>, window_params = [{transform_indices = @transform_0, window_bounds = array<i64: 16, 16>}, {pipeline_mode = #tpu.pipeline_mode<synchronous>, transform_indices = @transform_1, window_bounds = array<i64: 16, 128>}, {pipeline_mode = #tpu.pipeline_mode<synchronous>, transform_indices = @transform_2, window_bounds = array<i64: 1, 128>}, {pipeline_mode = #tpu.pipeline_mode<synchronous>, transform_indices = @transform_3, window_bounds = array<i64: 1, 128>}, {pipeline_mode = #tpu.pipeline_mode<synchronous>, transform_indices = @transform_4, window_bounds = array<i64: 1, 128>}, {pipeline_mode = #tpu.pipeline_mode<synchronous>, transform_indices = @transform_5, window_bounds = array<i64: 128, 128>}, {pipeline_mode = #tpu.pipeline_mode<synchronous>, transform_indices = @transform_6, window_bounds = array<i64: 1, 128>}, {pipeline_mode = #tpu.pipeline_mode<synchronous>, transform_indices = @transform_7, window_bounds = array<i64: 1, 128>}, {pipeline_mode = #tpu.pipeline_mode<synchronous>, transform_indices = @transform_8, window_bounds = array<i64: 1, 128>}, {pipeline_mode = #tpu.pipeline_mode<synchronous>, transform_indices = @transform_9, window_bounds = array<i64: 128, 128>}, {pipeline_mode = #tpu.pipeline_mode<synchronous>, transform_indices = @transform_10, window_bounds = array<i64: 1, 128>}, {transform_indices = @transform_11, window_bounds = array<i64: 16, 128>}]} {
    %c0 = arith.constant 0 : index
    %c0_0 = arith.constant 0 : index
    %0 = vector.load %arg1[%c0, %c0_0] : memref<16x16xf32, #tpu.memory_space<vmem>>, vector<16x16xf32>
    %c0_1 = arith.constant 0 : index
    %c0_2 = arith.constant 0 : index
    %1 = vector.load %arg2[%c0_1, %c0_2] : memref<16x128xbf16, #tpu.memory_space<vmem>>, vector<16x128xbf16>
    %c0_3 = arith.constant 0 : index
    %c0_4 = arith.constant 0 : index
    %2 = vector.load %arg3[%c0_3, %c0_4] : memref<1x128xf32, #tpu.memory_space<vmem>>, vector<1x128xf32>
    %3 = arith.truncf %0 : vector<16x16xf32> to vector<16x16xbf16>
    %cst = arith.constant dense<0.000000e+00> : vector<16x128xf32>
    %4 = tpu.matmul %3, %1, %cst {dimension_numbers = #tpu.dot_dimension_numbers<[1], [0], [0], [1], [0, 0, 1, 1], [], []>} : vector<16x16xbf16>, vector<16x128xbf16>, vector<16x128xf32> -> vector<16x128xf32>
    %5 = vector.broadcast %2 : vector<1x128xf32> to vector<16x128xf32>
    %6 = arith.addf %4, %5 : vector<16x128xf32>
    %c0_5 = arith.constant 0 : index
    %c0_6 = arith.constant 0 : index
    %7 = vector.load %arg4[%c0_5, %c0_6] : memref<1x128xf32, #tpu.memory_space<vmem>>, vector<1x128xf32>
    %c0_7 = arith.constant 0 : index
    %c0_8 = arith.constant 0 : index
    %8 = vector.load %arg5[%c0_7, %c0_8] : memref<1x128xf32, #tpu.memory_space<vmem>>, vector<1x128xf32>
    %cst_9 = arith.constant dense<0.000000e+00> : vector<16xf32>
    %9 = vector.multi_reduction <add>, %6, %cst_9 [1] : vector<16x128xf32> to vector<16xf32>
    %10 = vector.shape_cast %9 : vector<16xf32> to vector<16x1xf32>
    %cst_10 = arith.constant 1.562500e-02 : f32
    %11 = vector.broadcast %cst_10 : f32 to vector<16x1xf32>
    %12 = arith.mulf %10, %11 : vector<16x1xf32>
    %13 = vector.broadcast %12 : vector<16x1xf32> to vector<16x128xf32>
    %14 = arith.subf %6, %13 : vector<16x128xf32>
    %15 = arith.mulf %14, %14 : vector<16x128xf32>
    %cst_11 = arith.constant dense<0.000000e+00> : vector<16xf32>
    %16 = vector.multi_reduction <add>, %15, %cst_11 [1] : vector<16x128xf32> to vector<16xf32>
    %17 = vector.shape_cast %16 : vector<16xf32> to vector<16x1xf32>
    %18 = arith.mulf %12, %12 : vector<16x1xf32>
    %cst_12 = arith.constant 6.400000e+01 : f32
    %19 = vector.broadcast %cst_12 : f32 to vector<16x1xf32>
    %20 = arith.mulf %19, %18 : vector<16x1xf32>
    %21 = arith.subf %17, %20 : vector<16x1xf32>
    %cst_13 = arith.constant 1.562500e-02 : f32
    %22 = vector.broadcast %cst_13 : f32 to vector<16x1xf32>
    %23 = arith.mulf %21, %22 : vector<16x1xf32>
    %cst_14 = arith.constant 9.99999974E-6 : f32
    %24 = vector.broadcast %cst_14 : f32 to vector<16x1xf32>
    %25 = arith.addf %23, %24 : vector<16x1xf32>
    %26 = math.rsqrt %25 : vector<16x1xf32>
    %27 = vector.broadcast %26 : vector<16x1xf32> to vector<16x128xf32>
    %28 = vector.broadcast %7 : vector<1x128xf32> to vector<16x128xf32>
    %29 = arith.mulf %27, %28 : vector<16x128xf32>
    %30 = arith.mulf %14, %29 : vector<16x128xf32>
    %31 = vector.broadcast %8 : vector<1x128xf32> to vector<16x128xf32>
    %32 = arith.addf %30, %31 : vector<16x128xf32>
    %cst_15 = arith.constant 0.000000e+00 : f32
    %33 = vector.broadcast %cst_15 : f32 to vector<16x128xf32>
    %34 = arith.maximumf %32, %33 : vector<16x128xf32>
    %c0_16 = arith.constant 0 : index
    %c0_17 = arith.constant 0 : index
    %35 = vector.load %arg6[%c0_16, %c0_17] : memref<128x128xbf16, #tpu.memory_space<vmem>>, vector<128x128xbf16>
    %c0_18 = arith.constant 0 : index
    %c0_19 = arith.constant 0 : index
    %36 = vector.load %arg7[%c0_18, %c0_19] : memref<1x128xf32, #tpu.memory_space<vmem>>, vector<1x128xf32>
    %37 = arith.truncf %34 : vector<16x128xf32> to vector<16x128xbf16>
    %cst_20 = arith.constant dense<0.000000e+00> : vector<16x128xf32>
    %38 = tpu.matmul %37, %35, %cst_20 {dimension_numbers = #tpu.dot_dimension_numbers<[1], [0], [0], [1], [0, 0, 1, 1], [], []>} : vector<16x128xbf16>, vector<128x128xbf16>, vector<16x128xf32> -> vector<16x128xf32>
    %39 = vector.broadcast %36 : vector<1x128xf32> to vector<16x128xf32>
    %40 = arith.addf %38, %39 : vector<16x128xf32>
    %c0_21 = arith.constant 0 : index
    %c0_22 = arith.constant 0 : index
    %41 = vector.load %arg8[%c0_21, %c0_22] : memref<1x128xf32, #tpu.memory_space<vmem>>, vector<1x128xf32>
    %c0_23 = arith.constant 0 : index
    %c0_24 = arith.constant 0 : index
    %42 = vector.load %arg9[%c0_23, %c0_24] : memref<1x128xf32, #tpu.memory_space<vmem>>, vector<1x128xf32>
    %cst_25 = arith.constant dense<0.000000e+00> : vector<16xf32>
    %43 = vector.multi_reduction <add>, %40, %cst_25 [1] : vector<16x128xf32> to vector<16xf32>
    %44 = vector.shape_cast %43 : vector<16xf32> to vector<16x1xf32>
    %cst_26 = arith.constant 1.562500e-02 : f32
    %45 = vector.broadcast %cst_26 : f32 to vector<16x1xf32>
    %46 = arith.mulf %44, %45 : vector<16x1xf32>
    %47 = vector.broadcast %46 : vector<16x1xf32> to vector<16x128xf32>
    %48 = arith.subf %40, %47 : vector<16x128xf32>
    %49 = arith.mulf %48, %48 : vector<16x128xf32>
    %cst_27 = arith.constant dense<0.000000e+00> : vector<16xf32>
    %50 = vector.multi_reduction <add>, %49, %cst_27 [1] : vector<16x128xf32> to vector<16xf32>
    %51 = vector.shape_cast %50 : vector<16xf32> to vector<16x1xf32>
    %52 = arith.mulf %46, %46 : vector<16x1xf32>
    %cst_28 = arith.constant 6.400000e+01 : f32
    %53 = vector.broadcast %cst_28 : f32 to vector<16x1xf32>
    %54 = arith.mulf %53, %52 : vector<16x1xf32>
    %55 = arith.subf %51, %54 : vector<16x1xf32>
    %cst_29 = arith.constant 1.562500e-02 : f32
    %56 = vector.broadcast %cst_29 : f32 to vector<16x1xf32>
    %57 = arith.mulf %55, %56 : vector<16x1xf32>
    %cst_30 = arith.constant 9.99999974E-6 : f32
    %58 = vector.broadcast %cst_30 : f32 to vector<16x1xf32>
    %59 = arith.addf %57, %58 : vector<16x1xf32>
    %60 = math.rsqrt %59 : vector<16x1xf32>
    %61 = vector.broadcast %60 : vector<16x1xf32> to vector<16x128xf32>
    %62 = vector.broadcast %41 : vector<1x128xf32> to vector<16x128xf32>
    %63 = arith.mulf %61, %62 : vector<16x128xf32>
    %64 = arith.mulf %48, %63 : vector<16x128xf32>
    %65 = vector.broadcast %42 : vector<1x128xf32> to vector<16x128xf32>
    %66 = arith.addf %64, %65 : vector<16x128xf32>
    %cst_31 = arith.constant 0.000000e+00 : f32
    %67 = vector.broadcast %cst_31 : f32 to vector<16x128xf32>
    %68 = arith.maximumf %66, %67 : vector<16x128xf32>
    %c0_32 = arith.constant 0 : index
    %c0_33 = arith.constant 0 : index
    %69 = vector.load %arg10[%c0_32, %c0_33] : memref<128x128xbf16, #tpu.memory_space<vmem>>, vector<128x128xbf16>
    %c0_34 = arith.constant 0 : index
    %c0_35 = arith.constant 0 : index
    %70 = vector.load %arg11[%c0_34, %c0_35] : memref<1x128xf32, #tpu.memory_space<vmem>>, vector<1x128xf32>
    %71 = arith.truncf %68 : vector<16x128xf32> to vector<16x128xbf16>
    %cst_36 = arith.constant dense<0.000000e+00> : vector<16x128xf32>
    %72 = tpu.matmul %71, %69, %cst_36 {dimension_numbers = #tpu.dot_dimension_numbers<[1], [0], [0], [1], [0, 0, 1, 1], [], []>} : vector<16x128xbf16>, vector<128x128xbf16>, vector<16x128xf32> -> vector<16x128xf32>
    %73 = vector.broadcast %70 : vector<1x128xf32> to vector<16x128xf32>
    %74 = arith.addf %72, %73 : vector<16x128xf32>
    %75 = math.tanh %74 : vector<16x128xf32>
    %c0_37 = arith.constant 0 : index
    %c0_38 = arith.constant 0 : index
    %76 = vector.load %arg12[%c0_37, %c0_38] : memref<16x128xf32, #tpu.memory_space<vmem>>, vector<16x128xf32>
    tpu.vector_store %arg12[%c0_37, %c0_38], %75 {strides = array<i32>} : memref<16x128xf32, #tpu.memory_space<vmem>>, vector<16x128xf32>,
    return
  }
  func.func @transform_0(%arg0: i32) -> (i32, i32) {
    %c0_i32 = arith.constant 0 : i32
    %c0_i32_0 = arith.constant 0 : i32
    return %arg0, %c0_i32 : i32, i32
  }
  func.func @transform_1(%arg0: i32) -> (i32, i32) {
    %c0_i32 = arith.constant 0 : i32
    %c0_i32_0 = arith.constant 0 : i32
    %c0_i32_1 = arith.constant 0 : i32
    return %c0_i32, %c0_i32_0 : i32, i32
  }
  func.func @transform_2(%arg0: i32) -> (i32, i32) {
    %c0_i32 = arith.constant 0 : i32
    %c0_i32_0 = arith.constant 0 : i32
    %c0_i32_1 = arith.constant 0 : i32
    return %c0_i32, %c0_i32_0 : i32, i32
  }
  func.func @transform_3(%arg0: i32) -> (i32, i32) {
    %c0_i32 = arith.constant 0 : i32
    %c0_i32_0 = arith.constant 0 : i32
    %c0_i32_1 = arith.constant 0 : i32
    return %c0_i32, %c0_i32_0 : i32, i32
  }
  func.func @transform_4(%arg0: i32) -> (i32, i32) {
    %c0_i32 = arith.constant 0 : i32
    %c0_i32_0 = arith.constant 0 : i32
    %c0_i32_1 = arith.constant 0 : i32
    return %c0_i32, %c0_i32_0 : i32, i32
  }
  func.func @transform_5(%arg0: i32) -> (i32, i32) {
    %c0_i32 = arith.constant 0 : i32
    %c0_i32_0 = arith.constant 0 : i32
    %c0_i32_1 = arith.constant 0 : i32
    return %c0_i32, %c0_i32_0 : i32, i32
  }
  func.func @transform_6(%arg0: i32) -> (i32, i32) {
    %c0_i32 = arith.constant 0 : i32
    %c0_i32_0 = arith.constant 0 : i32
    %c0_i32_1 = arith.constant 0 : i32
    return %c0_i32, %c0_i32_0 : i32, i32
  }
  func.func @transform_7(%arg0: i32) -> (i32, i32) {
    %c0_i32 = arith.constant 0 : i32
    %c0_i32_0 = arith.constant 0 : i32
    %c0_i32_1 = arith.constant 0 : i32
    return %c0_i32, %c0_i32_0 : i32, i32
  }
  func.func @transform_8(%arg0: i32) -> (i32, i32) {
    %c0_i32 = arith.constant 0 : i32
    %c0_i32_0 = arith.constant 0 : i32
    %c0_i32_1 = arith.constant 0 : i32
    return %c0_i32, %c0_i32_0 : i32, i32
  }
  func.func @transform_9(%arg0: i32) -> (i32, i32) {
    %c0_i32 = arith.constant 0 : i32
    %c0_i32_0 = arith.constant 0 : i32
    %c0_i32_1 = arith.constant 0 : i32
    return %c0_i32, %c0_i32_0 : i32, i32
  }
  func.func @transform_10(%arg0: i32) -> (i32, i32) {
    %c0_i32 = arith.constant 0 : i32
    %c0_i32_0 = arith.constant 0 : i32
    %c0_i32_1 = arith.constant 0 : i32
    return %c0_i32, %c0_i32_0 : i32, i32
  }
  func.func @transform_11(%arg0: i32) -> (i32, i32) {
    %c0_i32 = arith.constant 0 : i32
    %c0_i32_0 = arith.constant 0 : i32
    return %arg0, %c0_i32 : i32, i32
  }
}

</mosaic_0001>

<bundles_post_ra>
// kernel: tpu_custom_call.1
= control target key start
LH: loop header
LB: loop body
LE: loop exit
PB: predicated region body
PF: predicated region fallthrough
CT: control target
= control target key end

     0   :  { %16 = vsyncpa [#allocation3], 0  ;;  %s800_s0 = inlined_call_operand.hbm [shape: f32[16,16], index: 0, kind: input, shape index: {}]   ;;  %s801_s1 = inlined_call_operand.hbm [shape: bf16[16,128], index: 1, kind: input, shape index: {}]   ;;  %s802_s2 = inlined_call_operand.vmem [shape: f32[1,128], index: 2, kind: input, shape index: {}]   ;;  %s803_s3 = inlined_call_operand.vmem [shape: f32[1,128], index: 3, kind: input, shape index: {}]   ;;  %s804_s4 = inlined_call_operand.vmem [shape: f32[1,128], index: 4, kind: input, shape index: {}]   ;;  %s805_s5 = inlined_call_operand.hbm [shape: bf16[128,128], index: 5, kind: input, shape index: {}]   ;;  %s806_s6 = inlined_call_operand.vmem [shape: f32[1,128], index: 6, kind: input, shape index: {}]   ;;  %s807_s7 = inlined_call_operand.vmem [shape: f32[1,128], index: 7, kind: input, shape index: {}]   ;;  %s808_s8 = inlined_call_operand.vmem [shape: f32[1,128], index: 8, kind: input, shape index: {}]   ;;  %s809_s9 = inlined_call_operand.hbm [shape: bf16[128,128], index: 9, kind: input, shape index: {}]   ;;  %s810_s10 = inlined_call_operand.vmem [shape: f32[1,128], index: 10, kind: input, shape index: {}]   ;;  %s811_s11 = inlined_call_operand.hbm [shape: f32[16,128], index: 11, kind: output, shape index: {}]  }
   0x1   :  { %17 = vsyncpa [#allocation6], 0 }
   0x2   :  { %18 = vsyncpa [#allocation9], 0  ;;  %s37_s19 = sshll.u32 %s801_s1, 4  ;;  %s38_s19 = int_to_ptr.hbm [resolvable:$true] %s37_s19 }
   0x3   :  { %19 = vsyncpa [#allocation4], 0  ;;  %s689_s20 = smov [#allocation5]   ;;  %s24_s24 = sshll.u32 %s800_s0, 4  ;;  %s25_s24 = int_to_ptr.hbm [resolvable:$true] %s24_s24 }
   0x4   :  { %s39_s21 = sshll.u32 %s689_s20, 4  ;;  %s690_s25 = smov 64   ;;  %s40_s21 = int_to_ptr.vmem [resolvable:$true] %s39_s21 }
   0x5   :  { %s691_s26 = smov 4   ;;  %s692_s27 = smov [#allocation2]  }
   0x6   :  { %45 = dma.hbm_to_vmem [thread:$0]  %s38_s19, 128, %s40_s21, [#allocation6], %s690_s25, %s690_s25, %s691_s26  }
   0x7   :  { %s26_s28 = sshll.u32 %s692_s27, 4  ;;  %s693_s29 = smov 128   ;;  %s27_s28 = int_to_ptr.vmem [resolvable:$true] %s26_s28 }
   0x8   :  { %s694_s30 = smov 8   ;;  %s56_s13 = sshll.u32 %s805_s5, 4  ;;  %s57_s13 = int_to_ptr.hbm [resolvable:$true] %s56_s13 }
   0x9   :  { %32 = dma.hbm_to_vmem [thread:$0]  %s25_s24, 256, %s27_s28, [#allocation3], %s693_s29, %s693_s29, %s694_s30  }
   0xa   :  { %s695_s14 = smov [#allocation7]   ;;  %s75_s17 = sshll.u32 %s809_s9, 4  ;;  %s76_s17 = int_to_ptr.hbm [resolvable:$true] %s75_s17 }
   0xb   :  { %s58_s0 = sshll.u32 %s695_s14, 4  ;;  %s696_s18 = smov [#allocation8]   ;;  %s59_s0 = int_to_ptr.vmem [resolvable:$true] %s58_s0 }
   0xc   :  { %64 = dma.hbm_to_vmem [thread:$0]  %s57_s13, 1024, %s59_s0, [#allocation6], %s690_s25, %s690_s25, %s691_s26  }
   0xd   :  { %s77_s19 = sshll.u32 %s696_s18, 4  ;;  %s78_s19 = int_to_ptr.vmem [resolvable:$true] %s77_s19 }
   0xe   :  { %83 = dma.hbm_to_vmem [thread:$0]  %s76_s17, 1024, %s78_s19, [#allocation9], %s690_s25, %s690_s25, %s691_s26  }
   0xf   :  { %681 = dma.done.wait [#allocation3], 256  }
  0x10   :  { %682 = vsyncadd [#allocation3], 4294967040 }
  0x11   :  { %683 = dma.done.wait [#allocation6], 1152  }
  0x12   :  { %684 = vsyncadd [#allocation6], 4294966144 }
  0x13   :  { %685 = dma.done.wait [#allocation9], 1024  }
  0x14   :  { %686 = vsyncadd [#allocation9], 4294966272  ;;  %v516_v0 = vld [vmem:[#allocation5] sm:$0xff]  ;;  %v103_v1 = vld [vmem:[#allocation2] sm:$0xff]  ;;  %vm118_vm0 = vcmask 130048   ;;  %s432_s12 = sshll.u32 %s811_s11, 4  ;;  %s433_s12 = int_to_ptr.hbm [resolvable:$true] %s432_s12 }
  0x15   :  { %v104_v2 = vld [vmem:[#allocation2 + $0x8] sm:$0xff]  ;;  %129 = vmatpush.bf16.msra.mxu0 %v516_v0  ;;  %v542_v4 = vld [vmem:[%s802_s2] ss:$0 sm:$0xff]  ;;  %v524_v17 = vld [vmem:[#allocation7 + $0x38] sm:$0xff] }
  0x16   :  { %v108_v3 = vpack.c.bf16 %v104_v2, %v103_v1  ;;  %265 = vmatpush.bf16.msra.mxu1 %v524_v17  ;;  %v523_v18 = vld [vmem:[#allocation7 + $0x30] sm:$0xff]  ;;  %v522_v19 = vld [vmem:[#allocation7 + $0x28] sm:$0xff]  ;;  %v521_v20 = vld [vmem:[#allocation7 + $0x20] sm:$0xff] }
  0x17   :  { %v520_v21 = vld [vmem:[#allocation7 + $0x18] sm:$0xff]  ;;  %v519_v23 = vld [vmem:[#allocation7 + $0x10] sm:$0xff]  ;;  %v518_v26 = vld [vmem:[#allocation7 + $0x8] sm:$0xff] }
  0x18   :  { %451 = vmatmul.msk.bf16.vlgmr.msra.gmra.mxu0 %vm118_vm0, %v108_v3  ;;  %v517_v30 = vld [vmem:[#allocation7] sm:$0xff]  ;;  %v543_v45 = vld [vmem:[%s803_s3] ss:$0 sm:$0xff]  ;;  %v527_v17 = vld [vmem:[#allocation8 + $0x10] sm:$0xff] }
  0x19   :  { %v544_v53 = vld [vmem:[%s804_s4] ss:$0 sm:$0xff] }
  0x1a   :  { %266 = vmatpush.bf16.msra.mxu1 %v523_v18  ;;  %v545_v62 = vld [vmem:[%s806_s6] ss:$0 sm:$0xff] }
  0x1e   :  { %267 = vmatpush.bf16.msra.mxu1 %v522_v19 }
  0x22   :  { %268 = vmatpush.bf16.msra.mxu1 %v521_v20  ;;  %v526_v20 = vld [vmem:[#allocation8 + $0x8] sm:$0xff] }
  0x26   :  { %269 = vmatpush.bf16.msra.mxu1 %v520_v21 }
  0x2a   :  { %270 = vmatpush.bf16.msra.mxu1 %v519_v23 }
  0x2e   :  { %271 = vmatpush.bf16.msra.mxu1 %v518_v26 }
  0x32   :  { %272 = vmatpush.bf16.msra.mxu1 %v517_v30 }
  0x95   :  { %v131_v5 = vpop.f32.mrf.mxu0 }
  0x96   :  { %v132_v6 = vadd.f32 %v542_v4, %v131_v5 }
  0x98   :  { %138 = vadd.xlane.f32.xlu0 %v132_v6 }
  0x9d   :  { %v133_v7 = vpop.f32.mrf.mxu0 }
  0x9e   :  { %v134_v8 = vadd.f32 %v542_v4, %v133_v7 }
  0xa0   :  { %140 = vadd.xlane.f32.xlu0 %v134_v8 }
 0x10b   :  { %v139_v9 = vpop.xlane.xlu0 %138 }
 0x10c   :  { %v142_v10 = vmul.f32 0.015625, %v139_v9 }
 0x10e   :  { %v144_v11 = vsub.f32 %v132_v6, %v142_v10  ;;  %v152_v22 = vmul.f32 %v142_v10, %v142_v10 }
 0x110   :  { %v146_v12 = vmul.f32 %v144_v11, %v144_v11  ;;  %v154_v24 = vmul.f32 64.0, %v152_v22 }
 0x112   :  { %148 = vadd.xlane.f32.xlu1 %v146_v12  ;;  %v531_v12 = vld [vmem:[#allocation8 + $0x30] sm:$0xff] }
 0x113   :  { %v141_v13 = vpop.xlane.xlu0 %140 }
 0x114   :  { %v143_v14 = vmul.f32 0.015625, %v141_v13  ;;  %v530_v13 = vld [vmem:[#allocation8 + $0x28] sm:$0xff] }
 0x116   :  { %v145_v15 = vsub.f32 %v134_v8, %v143_v14  ;;  %v153_v28 = vmul.f32 %v143_v14, %v143_v14  ;;  %v529_v14 = vld [vmem:[#allocation8 + $0x20] sm:$0xff] }
 0x118   :  { %v147_v16 = vmul.f32 %v145_v15, %v145_v15  ;;  %v155_v32 = vmul.f32 64.0, %v153_v28 }
 0x11a   :  { %150 = vadd.xlane.f32.xlu1 %v147_v16 }
 0x185   :  { %v149_v25 = vpop.xlane.xlu1 %148 }
 0x186   :  { %v156_v27 = vsub.f32 %v149_v25, %v154_v24  ;;  %v525_v24 = vld [vmem:[#allocation8] sm:$0xff] }
 0x188   :  { %v158_v29 = vmul.f32 0.015625, %v156_v27 }
 0x18a   :  { %v160_v31 = vadd.f32 1e-05, %v158_v29 }
 0x18c   :  { %549 = vrsqrt.f32 %v160_v31  ;;  %vm168_vm2 = vweird.f32 %v160_v31 }
 0x18d   :  { %v151_v33 = vpop.xlane.xlu1 %150 }
 0x18e   :  { %v157_v34 = vsub.f32 %v151_v33, %v155_v32 }
 0x190   :  { %v159_v35 = vmul.f32 0.015625, %v157_v34 }
 0x192   :  { %v550_v36 = vpop.eup %549  ;;  %v161_v37 = vadd.f32 1e-05, %v159_v35 }
 0x193   :  { %v163_v38 = vmul.f32 %v550_v36, %v160_v31  ;;  %vm169_vm1 = vweird.f32 %v550_v36 }
 0x194   :  { %551 = vrsqrt.f32 %v161_v37  ;;  %vm170_vm3 = vmor %vm168_vm2, %vm169_vm1  ;;  %vm178_vm5 = vweird.f32 %v161_v37 }
 0x195   :  { %v164_v39 = vmul.f32 %v550_v36, %v163_v38 }
 0x197   :  { %v165_v40 = vmul.f32 0.5, %v164_v39  ;;  %v546_v39 = vld [vmem:[%s807_s7] ss:$0 sm:$0xff] }
 0x199   :  { %v166_v41 = vsub.f32 1.5, %v165_v40 }
 0x19a   :  { %v552_v42 = vpop.eup %551 }
 0x19b   :  { %v167_v43 = vmul.f32 %v550_v36, %v166_v41  ;;  %v173_v44 = vmul.f32 %v552_v42, %v161_v37  ;;  %vm179_vm4 = vweird.f32 %v552_v42 }
 0x19c   :  { %vm180_vm6 = vmor %vm178_vm5, %vm179_vm4 }
 0x19d   :  { %v174_v46 = vmul.f32 %v552_v42, %v173_v44  ;;  %v171_v47 = vsel %vm170_vm3, %v550_v36, %v167_v43 }
 0x19e   :  { %v185_v49 = vmul.f32 %v543_v45, %v171_v47  ;;  %v547_v47 = vld [vmem:[%s808_s8] ss:$0 sm:$0xff]  ;;  %s697_s8 = smov [#allocation10]  }
 0x19f   :  { %v175_v48 = vmul.f32 0.5, %v174_v46  ;;  %s430_s27 = sshll.u32 %s697_s8, 4  ;;  %s431_s27 = int_to_ptr.vmem [resolvable:$true] %s430_s27 }
 0x1a0   :  { %v187_v52 = vmul.f32 %v185_v49, %v144_v11  ;;  %v532_v11 = vld [vmem:[#allocation8 + $0x38] sm:$0xff] }
 0x1a1   :  { %v176_v50 = vsub.f32 1.5, %v175_v48  ;;  %408 = vmatpush.bf16.msra.mxu2 %v532_v11 }
 0x1a2   :  { %v192_v57 = vadd.f32 %v544_v53, %v187_v52 }
 0x1a3   :  { %v177_v51 = vmul.f32 %v552_v42, %v176_v50 }
 0x1a4   :  { %v194_v59 = vmax.f32 %v192_v57, 0.0 }
 0x1a5   :  { %v181_v54 = vsel %vm180_vm6, %v552_v42, %v177_v51  ;;  %409 = vmatpush.bf16.msra.mxu2 %v531_v12 }
 0x1a6   :  { %v186_v55 = vmul.f32 %v543_v45, %v181_v54 }
 0x1a8   :  { %v188_v56 = vmul.f32 %v186_v55, %v145_v15  ;;  %v528_v15 = vld [vmem:[#allocation8 + $0x18] sm:$0xff] }
 0x1a9   :  { %410 = vmatpush.bf16.msra.mxu2 %v530_v13 }
 0x1aa   :  { %v193_v58 = vadd.f32 %v544_v53, %v188_v56  ;;  %v548_v56 = vld [vmem:[%s810_s10] ss:$0 sm:$0xff] }
 0x1ac   :  { %v195_v60 = vmax.f32 %v193_v58, 0.0 }
 0x1ad   :  { %411 = vmatpush.bf16.msra.mxu2 %v529_v14 }
 0x1ae   :  { %v213_v61 = vpack.c.bf16 %v195_v60, %v194_v59 }
 0x1b0   :  { %273 = vmatmul.bf16.vlgmr.msra.gmra.mxu1 %v213_v61 }
 0x1b1   :  { %412 = vmatpush.bf16.msra.mxu2 %v528_v15 }
 0x1b5   :  { %413 = vmatpush.bf16.msra.mxu2 %v527_v17 }
 0x1b9   :  { %414 = vmatpush.bf16.msra.mxu2 %v526_v20 }
 0x1bd   :  { %415 = vmatpush.bf16.msra.mxu2 %v525_v24 }
 0x22d   :  { %v274_v63 = vpop.f32.mrf.mxu1 }
 0x22e   :  { %v275_v0 = vadd.f32 %v545_v62, %v274_v63 }
 0x230   :  { %281 = vadd.xlane.f32.xlu2 %v275_v0 }
 0x235   :  { %v276_v1 = vpop.f32.mrf.mxu1 }
 0x236   :  { %v277_v2 = vadd.f32 %v545_v62, %v276_v1 }
 0x238   :  { %283 = vadd.xlane.f32.xlu2 %v277_v2 }
 0x2a3   :  { %v282_v3 = vpop.xlane.xlu2 %281 }
 0x2a4   :  { %v285_v4 = vmul.f32 0.015625, %v282_v3 }
 0x2a6   :  { %v287_v5 = vsub.f32 %v275_v0, %v285_v4  ;;  %v295_v16 = vmul.f32 %v285_v4, %v285_v4 }
 0x2a8   :  { %v289_v6 = vmul.f32 %v287_v5, %v287_v5  ;;  %v297_v18 = vmul.f32 64.0, %v295_v16 }
 0x2aa   :  { %291 = vadd.xlane.f32.xlu0 %v289_v6 }
 0x2ab   :  { %v284_v7 = vpop.xlane.xlu2 %283 }
 0x2ac   :  { %v286_v8 = vmul.f32 0.015625, %v284_v7 }
 0x2ae   :  { %v288_v9 = vsub.f32 %v277_v2, %v286_v8  ;;  %v296_v22 = vmul.f32 %v286_v8, %v286_v8 }
 0x2b0   :  { %v290_v10 = vmul.f32 %v288_v9, %v288_v9  ;;  %v298_v26 = vmul.f32 64.0, %v296_v22 }
 0x2b2   :  { %293 = vadd.xlane.f32.xlu1 %v290_v10 }
 0x31d   :  { %v292_v19 = vpop.xlane.xlu0 %291 }
 0x31e   :  { %v299_v21 = vsub.f32 %v292_v19, %v297_v18 }
 0x320   :  { %v301_v23 = vmul.f32 0.015625, %v299_v21 }
 0x322   :  { %v303_v25 = vadd.f32 1e-05, %v301_v23 }
 0x324   :  { %553 = vrsqrt.f32 %v303_v25  ;;  %vm311_vm8 = vweird.f32 %v303_v25 }
 0x325   :  { %v294_v27 = vpop.xlane.xlu1 %293 }
 0x326   :  { %v300_v28 = vsub.f32 %v294_v27, %v298_v26 }
 0x328   :  { %v302_v29 = vmul.f32 0.015625, %v300_v28 }
 0x32a   :  { %v554_v30 = vpop.eup %553  ;;  %v304_v31 = vadd.f32 1e-05, %v302_v29 }
 0x32b   :  { %v306_v32 = vmul.f32 %v554_v30, %v303_v25  ;;  %vm312_vm7 = vweird.f32 %v554_v30 }
 0x32c   :  { %555 = vrsqrt.f32 %v304_v31  ;;  %vm313_vm9 = vmor %vm311_vm8, %vm312_vm7  ;;  %vm321_vm11 = vweird.f32 %v304_v31 }
 0x32d   :  { %v307_v33 = vmul.f32 %v554_v30, %v306_v32 }
 0x32f   :  { %v308_v34 = vmul.f32 0.5, %v307_v33 }
 0x331   :  { %v309_v35 = vsub.f32 1.5, %v308_v34 }
 0x332   :  { %v556_v36 = vpop.eup %555 }
 0x333   :  { %v310_v37 = vmul.f32 %v554_v30, %v309_v35  ;;  %v316_v38 = vmul.f32 %v556_v36, %v304_v31  ;;  %vm322_vm10 = vweird.f32 %v556_v36 }
 0x334   :  { %vm323_vm12 = vmor %vm321_vm11, %vm322_vm10 }
 0x335   :  { %v317_v40 = vmul.f32 %v556_v36, %v316_v38  ;;  %v314_v41 = vsel %vm313_vm9, %v554_v30, %v310_v37 }
 0x336   :  { %v328_v43 = vmul.f32 %v546_v39, %v314_v41 }
 0x337   :  { %v318_v42 = vmul.f32 0.5, %v317_v40 }
 0x338   :  { %v330_v46 = vmul.f32 %v328_v43, %v287_v5 }
 0x339   :  { %v319_v44 = vsub.f32 1.5, %v318_v42 }
 0x33a   :  { %v335_v51 = vadd.f32 %v547_v47, %v330_v46 }
 0x33b   :  { %v320_v45 = vmul.f32 %v556_v36, %v319_v44 }
 0x33c   :  { %v337_v53 = vmax.f32 %v335_v51, 0.0 }
 0x33d   :  { %v324_v48 = vsel %vm323_vm12, %v556_v36, %v320_v45 }
 0x33e   :  { %v329_v49 = vmul.f32 %v546_v39, %v324_v48 }
 0x340   :  { %v331_v50 = vmul.f32 %v329_v49, %v288_v9 }
 0x342   :  { %v336_v52 = vadd.f32 %v547_v47, %v331_v50 }
 0x344   :  { %v338_v54 = vmax.f32 %v336_v52, 0.0 }
 0x346   :  { %v356_v55 = vpack.c.bf16 %v338_v54, %v337_v53 }
 0x348   :  { %416 = vmatmul.bf16.vlgmr.msra.gmra.mxu2 %v356_v55 }
 0x3cb   :  { %v417_v57 = vpop.f32.mrf.mxu2 }
 0x3cc   :  { %v418_v58 = vadd.f32 %v548_v56, %v417_v57 }
 0x3ce   :  { %557 = vtanh.f32 %v418_v58 }
 0x3d3   :  { %v419_v59 = vpop.f32.mrf.mxu2 }
 0x3d4   :  { %v558_v60 = vpop.eup %557  ;;  %v420_v61 = vadd.f32 %v548_v56, %v419_v59 }
 0x3d5   :  { %424 = vst [vmem:[#allocation10] sm:$0xff] %v558_v60 }
 0x3d6   :  { %559 = vtanh.f32 %v420_v61 }
 0x3dc   :  { %v560_v62 = vpop.eup %559 }
 0x3dd   :  { %425 = vst [vmem:[#allocation10 + $0x8] sm:$0xff] %v560_v62 }
 0x3de   :  { %438 = dma.vmem_to_hbm [thread:$0]  %s431_s27, 256, %s433_s12, [#allocation4], %s693_s29, %s693_s29, %s694_s30  }
 0x3df   :  { %687 = dma.done.wait [#allocation4], 256  }
 0x3e0   :  { %688 = vsyncadd [#allocation4], 4294967040 }
 0x3e1   :  { %443 = vsyncpa [#allocation3], 1 }
 0x3e2   :  { %444 = vsyncpa [#allocation6], 1 }
 0x3e3   :  { %445 = vsyncpa [#allocation9], 1 }
 0x3e4   :  { %446 = vsyncpa [#allocation4], 1 }

// kernel: tpu_custom_call.1
= control target key start
LH: loop header
LB: loop body
LE: loop exit
PB: predicated region body
PF: predicated region fallthrough
CT: control target
= control target key end

     0   :  { %16 = vsyncpa [#allocation3], 0  ;;  %s800_s0 = inlined_call_operand.hbm [shape: f32[16,16], index: 0, kind: input, shape index: {}]   ;;  %s801_s1 = inlined_call_operand.hbm [shape: bf16[16,128], index: 1, kind: input, shape index: {}]   ;;  %s802_s2 = inlined_call_operand.vmem [shape: f32[1,128], index: 2, kind: input, shape index: {}]   ;;  %s803_s3 = inlined_call_operand.vmem [shape: f32[1,128], index: 3, kind: input, shape index: {}]   ;;  %s804_s4 = inlined_call_operand.vmem [shape: f32[1,128], index: 4, kind: input, shape index: {}]   ;;  %s805_s5 = inlined_call_operand.hbm [shape: bf16[128,128], index: 5, kind: input, shape index: {}]   ;;  %s806_s6 = inlined_call_operand.vmem [shape: f32[1,128], index: 6, kind: input, shape index: {}]   ;;  %s807_s7 = inlined_call_operand.vmem [shape: f32[1,128], index: 7, kind: input, shape index: {}]   ;;  %s808_s8 = inlined_call_operand.vmem [shape: f32[1,128], index: 8, kind: input, shape index: {}]   ;;  %s809_s9 = inlined_call_operand.hbm [shape: bf16[128,128], index: 9, kind: input, shape index: {}]   ;;  %s810_s10 = inlined_call_operand.vmem [shape: f32[1,128], index: 10, kind: input, shape index: {}]   ;;  %s811_s11 = inlined_call_operand.hbm [shape: f32[16,128], index: 11, kind: output, shape index: {}]  }
   0x1   :  { %17 = vsyncpa [#allocation6], 0 }
   0x2   :  { %18 = vsyncpa [#allocation9], 0  ;;  %s37_s19 = sshll.u32 %s801_s1, 4  ;;  %s38_s19 = int_to_ptr.hbm [resolvable:$true] %s37_s19 }
   0x3   :  { %19 = vsyncpa [#allocation4], 0  ;;  %s689_s20 = smov [#allocation5]   ;;  %s24_s24 = sshll.u32 %s800_s0, 4  ;;  %s25_s24 = int_to_ptr.hbm [resolvable:$true] %s24_s24 }
   0x4   :  { %s39_s21 = sshll.u32 %s689_s20, 4  ;;  %s690_s25 = smov 64   ;;  %s40_s21 = int_to_ptr.vmem [resolvable:$true] %s39_s21 }
   0x5   :  { %s691_s26 = smov 4   ;;  %s692_s27 = smov [#allocation2]  }
   0x6   :  { %45 = dma.hbm_to_vmem [thread:$0]  %s38_s19, 128, %s40_s21, [#allocation6], %s690_s25, %s690_s25, %s691_s26  }
   0x7   :  { %s26_s28 = sshll.u32 %s692_s27, 4  ;;  %s693_s29 = smov 128   ;;  %s27_s28 = int_to_ptr.vmem [resolvable:$true] %s26_s28 }
   0x8   :  { %s694_s30 = smov 8   ;;  %s56_s13 = sshll.u32 %s805_s5, 4  ;;  %s57_s13 = int_to_ptr.hbm [resolvable:$true] %s56_s13 }
   0x9   :  { %32 = dma.hbm_to_vmem [thread:$0]  %s25_s24, 256, %s27_s28, [#allocation3], %s693_s29, %s693_s29, %s694_s30  }
   0xa   :  { %s695_s14 = smov [#allocation7]   ;;  %s75_s17 = sshll.u32 %s809_s9, 4  ;;  %s76_s17 = int_to_ptr.hbm [resolvable:$true] %s75_s17 }
   0xb   :  { %s58_s0 = sshll.u32 %s695_s14, 4  ;;  %s696_s18 = smov [#allocation8]   ;;  %s59_s0 = int_to_ptr.vmem [resolvable:$true] %s58_s0 }
   0xc   :  { %64 = dma.hbm_to_vmem [thread:$0]  %s57_s13, 1024, %s59_s0, [#allocation6], %s690_s25, %s690_s25, %s691_s26  }
   0xd   :  { %s77_s19 = sshll.u32 %s696_s18, 4  ;;  %s78_s19 = int_to_ptr.vmem [resolvable:$true] %s77_s19 }
   0xe   :  { %83 = dma.hbm_to_vmem [thread:$0]  %s76_s17, 1024, %s78_s19, [#allocation9], %s690_s25, %s690_s25, %s691_s26  }
   0xf   :  { %681 = dma.done.wait [#allocation3], 256  }
  0x10   :  { %682 = vsyncadd [#allocation3], 4294967040 }
  0x11   :  { %683 = dma.done.wait [#allocation6], 1152  }
  0x12   :  { %684 = vsyncadd [#allocation6], 4294966144 }
  0x13   :  { %685 = dma.done.wait [#allocation9], 1024  }
  0x14   :  { %686 = vsyncadd [#allocation9], 4294966272  ;;  %v516_v0 = vld [vmem:[#allocation5] sm:$0xff]  ;;  %v103_v1 = vld [vmem:[#allocation2] sm:$0xff]  ;;  %vm118_vm0 = vcmask 130048   ;;  %s432_s12 = sshll.u32 %s811_s11, 4  ;;  %s433_s12 = int_to_ptr.hbm [resolvable:$true] %s432_s12 }
  0x15   :  { %v104_v2 = vld [vmem:[#allocation2 + $0x8] sm:$0xff]  ;;  %129 = vmatpush.bf16.msra.mxu0 %v516_v0  ;;  %v542_v4 = vld [vmem:[%s802_s2] ss:$0 sm:$0xff]  ;;  %v524_v17 = vld [vmem:[#allocation7 + $0x38] sm:$0xff] }
  0x16   :  { %v108_v3 = vpack.c.bf16 %v104_v2, %v103_v1  ;;  %265 = vmatpush.bf16.msra.mxu1 %v524_v17  ;;  %v523_v18 = vld [vmem:[#allocation7 + $0x30] sm:$0xff]  ;;  %v522_v19 = vld [vmem:[#allocation7 + $0x28] sm:$0xff]  ;;  %v521_v20 = vld [vmem:[#allocation7 + $0x20] sm:$0xff] }
  0x17   :  { %v520_v21 = vld [vmem:[#allocation7 + $0x18] sm:$0xff]  ;;  %v519_v23 = vld [vmem:[#allocation7 + $0x10] sm:$0xff]  ;;  %v518_v26 = vld [vmem:[#allocation7 + $0x8] sm:$0xff] }
  0x18   :  { %451 = vmatmul.msk.bf16.vlgmr.msra.gmra.mxu0 %vm118_vm0, %v108_v3  ;;  %v517_v30 = vld [vmem:[#allocation7] sm:$0xff]  ;;  %v543_v45 = vld [vmem:[%s803_s3] ss:$0 sm:$0xff]  ;;  %v527_v17 = vld [vmem:[#allocation8 + $0x10] sm:$0xff] }
  0x19   :  { %v544_v53 = vld [vmem:[%s804_s4] ss:$0 sm:$0xff] }
  0x1a   :  { %266 = vmatpush.bf16.msra.mxu1 %v523_v18  ;;  %v545_v62 = vld [vmem:[%s806_s6] ss:$0 sm:$0xff] }
  0x1e   :  { %267 = vmatpush.bf16.msra.mxu1 %v522_v19 }
  0x22   :  { %268 = vmatpush.bf16.msra.mxu1 %v521_v20  ;;  %v526_v20 = vld [vmem:[#allocation8 + $0x8] sm:$0xff] }
  0x26   :  { %269 = vmatpush.bf16.msra.mxu1 %v520_v21 }
  0x2a   :  { %270 = vmatpush.bf16.msra.mxu1 %v519_v23 }
  0x2e   :  { %271 = vmatpush.bf16.msra.mxu1 %v518_v26 }
  0x32   :  { %272 = vmatpush.bf16.msra.mxu1 %v517_v30 }
  0x95   :  { %v131_v5 = vpop.f32.mrf.mxu0 }
  0x96   :  { %v132_v6 = vadd.f32 %v542_v4, %v131_v5 }
  0x98   :  { %138 = vadd.xlane.f32.xlu0 %v132_v6 }
  0x9d   :  { %v133_v7 = vpop.f32.mrf.mxu0 }
  0x9e   :  { %v134_v8 = vadd.f32 %v542_v4, %v133_v7 }
  0xa0   :  { %140 = vadd.xlane.f32.xlu0 %v134_v8 }
 0x10b   :  { %v139_v9 = vpop.xlane.xlu0 %138 }
 0x10c   :  { %v142_v10 = vmul.f32 0.015625, %v139_v9 }
 0x10e   :  { %v144_v11 = vsub.f32 %v132_v6, %v142_v10  ;;  %v152_v22 = vmul.f32 %v142_v10, %v142_v10 }
 0x110   :  { %v146_v12 = vmul.f32 %v144_v11, %v144_v11  ;;  %v154_v24 = vmul.f32 64.0, %v152_v22 }
 0x112   :  { %148 = vadd.xlane.f32.xlu1 %v146_v12  ;;  %v531_v12 = vld [vmem:[#allocation8 + $0x30] sm:$0xff] }
 0x113   :  { %v141_v13 = vpop.xlane.xlu0 %140 }
 0x114   :  { %v143_v14 = vmul.f32 0.015625, %v141_v13  ;;  %v530_v13 = vld [vmem:[#allocation8 + $0x28] sm:$0xff] }
 0x116   :  { %v145_v15 = vsub.f32 %v134_v8, %v143_v14  ;;  %v153_v28 = vmul.f32 %v143_v14, %v143_v14  ;;  %v529_v14 = vld [vmem:[#allocation8 + $0x20] sm:$0xff] }
 0x118   :  { %v147_v16 = vmul.f32 %v145_v15, %v145_v15  ;;  %v155_v32 = vmul.f32 64.0, %v153_v28 }
 0x11a   :  { %150 = vadd.xlane.f32.xlu1 %v147_v16 }
 0x185   :  { %v149_v25 = vpop.xlane.xlu1 %148 }
 0x186   :  { %v156_v27 = vsub.f32 %v149_v25, %v154_v24  ;;  %v525_v24 = vld [vmem:[#allocation8] sm:$0xff] }
 0x188   :  { %v158_v29 = vmul.f32 0.015625, %v156_v27 }
 0x18a   :  { %v160_v31 = vadd.f32 1e-05, %v158_v29 }
 0x18c   :  { %549 = vrsqrt.f32 %v160_v31  ;;  %vm168_vm2 = vweird.f32 %v160_v31 }
 0x18d   :  { %v151_v33 = vpop.xlane.xlu1 %150 }
 0x18e   :  { %v157_v34 = vsub.f32 %v151_v33, %v155_v32 }
 0x190   :  { %v159_v35 = vmul.f32 0.015625, %v157_v34 }
 0x192   :  { %v550_v36 = vpop.eup %549  ;;  %v161_v37 = vadd.f32 1e-05, %v159_v35 }
 0x193   :  { %v163_v38 = vmul.f32 %v550_v36, %v160_v31  ;;  %vm169_vm1 = vweird.f32 %v550_v36 }
 0x194   :  { %551 = vrsqrt.f32 %v161_v37  ;;  %vm170_vm3 = vmor %vm168_vm2, %vm169_vm1  ;;  %vm178_vm5 = vweird.f32 %v161_v37 }
 0x195   :  { %v164_v39 = vmul.f32 %v550_v36, %v163_v38 }
 0x197   :  { %v165_v40 = vmul.f32 0.5, %v164_v39  ;;  %v546_v39 = vld [vmem:[%s807_s7] ss:$0 sm:$0xff] }
 0x199   :  { %v166_v41 = vsub.f32 1.5, %v165_v40 }
 0x19a   :  { %v552_v42 = vpop.eup %551 }
 0x19b   :  { %v167_v43 = vmul.f32 %v550_v36, %v166_v41  ;;  %v173_v44 = vmul.f32 %v552_v42, %v161_v37  ;;  %vm179_vm4 = vweird.f32 %v552_v42 }
 0x19c   :  { %vm180_vm6 = vmor %vm178_vm5, %vm179_vm4 }
 0x19d   :  { %v174_v46 = vmul.f32 %v552_v42, %v173_v44  ;;  %v171_v47 = vsel %vm170_vm3, %v550_v36, %v167_v43 }
 0x19e   :  { %v185_v49 = vmul.f32 %v543_v45, %v171_v47  ;;  %v547_v47 = vld [vmem:[%s808_s8] ss:$0 sm:$0xff]  ;;  %s697_s8 = smov [#allocation10]  }
 0x19f   :  { %v175_v48 = vmul.f32 0.5, %v174_v46  ;;  %s430_s27 = sshll.u32 %s697_s8, 4  ;;  %s431_s27 = int_to_ptr.vmem [resolvable:$true] %s430_s27 }
 0x1a0   :  { %v187_v52 = vmul.f32 %v185_v49, %v144_v11  ;;  %v532_v11 = vld [vmem:[#allocation8 + $0x38] sm:$0xff] }
 0x1a1   :  { %v176_v50 = vsub.f32 1.5, %v175_v48  ;;  %408 = vmatpush.bf16.msra.mxu2 %v532_v11 }
 0x1a2   :  { %v192_v57 = vadd.f32 %v544_v53, %v187_v52 }
 0x1a3   :  { %v177_v51 = vmul.f32 %v552_v42, %v176_v50 }
 0x1a4   :  { %v194_v59 = vmax.f32 %v192_v57, 0.0 }
 0x1a5   :  { %v181_v54 = vsel %vm180_vm6, %v552_v42, %v177_v51  ;;  %409 = vmatpush.bf16.msra.mxu2 %v531_v12 }
 0x1a6   :  { %v186_v55 = vmul.f32 %v543_v45, %v181_v54 }
 0x1a8   :  { %v188_v56 = vmul.f32 %v186_v55, %v145_v15  ;;  %v528_v15 = vld [vmem:[#allocation8 + $0x18] sm:$0xff] }
 0x1a9   :  { %410 = vmatpush.bf16.msra.mxu2 %v530_v13 }
 0x1aa   :  { %v193_v58 = vadd.f32 %v544_v53, %v188_v56  ;;  %v548_v56 = vld [vmem:[%s810_s10] ss:$0 sm:$0xff] }
 0x1ac   :  { %v195_v60 = vmax.f32 %v193_v58, 0.0 }
 0x1ad   :  { %411 = vmatpush.bf16.msra.mxu2 %v529_v14 }
 0x1ae   :  { %v213_v61 = vpack.c.bf16 %v195_v60, %v194_v59 }
 0x1b0   :  { %273 = vmatmul.bf16.vlgmr.msra.gmra.mxu1 %v213_v61 }
 0x1b1   :  { %412 = vmatpush.bf16.msra.mxu2 %v528_v15 }
 0x1b5   :  { %413 = vmatpush.bf16.msra.mxu2 %v527_v17 }
 0x1b9   :  { %414 = vmatpush.bf16.msra.mxu2 %v526_v20 }
 0x1bd   :  { %415 = vmatpush.bf16.msra.mxu2 %v525_v24 }
 0x22d   :  { %v274_v63 = vpop.f32.mrf.mxu1 }
 0x22e   :  { %v275_v0 = vadd.f32 %v545_v62, %v274_v63 }
 0x230   :  { %281 = vadd.xlane.f32.xlu2 %v275_v0 }
 0x235   :  { %v276_v1 = vpop.f32.mrf.mxu1 }
 0x236   :  { %v277_v2 = vadd.f32 %v545_v62, %v276_v1 }
 0x238   :  { %283 = vadd.xlane.f32.xlu2 %v277_v2 }
 0x2a3   :  { %v282_v3 = vpop.xlane.xlu2 %281 }
 0x2a4   :  { %v285_v4 = vmul.f32 0.015625, %v282_v3 }
 0x2a6   :  { %v287_v5 = vsub.f32 %v275_v0, %v285_v4  ;;  %v295_v16 = vmul.f32 %v285_v4, %v285_v4 }
 0x2a8   :  { %v289_v6 = vmul.f32 %v287_v5, %v287_v5  ;;  %v297_v18 = vmul.f32 64.0, %v295_v16 }
 0x2aa   :  { %291 = vadd.xlane.f32.xlu0 %v289_v6 }
 0x2ab   :  { %v284_v7 = vpop.xlane.xlu2 %283 }
 0x2ac   :  { %v286_v8 = vmul.f32 0.015625, %v284_v7 }
 0x2ae   :  { %v288_v9 = vsub.f32 %v277_v2, %v286_v8  ;;  %v296_v22 = vmul.f32 %v286_v8, %v286_v8 }
 0x2b0   :  { %v290_v10 = vmul.f32 %v288_v9, %v288_v9  ;;  %v298_v26 = vmul.f32 64.0, %v296_v22 }
 0x2b2   :  { %293 = vadd.xlane.f32.xlu1 %v290_v10 }
 0x31d   :  { %v292_v19 = vpop.xlane.xlu0 %291 }
 0x31e   :  { %v299_v21 = vsub.f32 %v292_v19, %v297_v18 }
 0x320   :  { %v301_v23 = vmul.f32 0.015625, %v299_v21 }
 0x322   :  { %v303_v25 = vadd.f32 1e-05, %v301_v23 }
 0x324   :  { %553 = vrsqrt.f32 %v303_v25  ;;  %vm311_vm8 = vweird.f32 %v303_v25 }
 0x325   :  { %v294_v27 = vpop.xlane.xlu1 %293 }
 0x326   :  { %v300_v28 = vsub.f32 %v294_v27, %v298_v26 }
 0x328   :  { %v302_v29 = vmul.f32 0.015625, %v300_v28 }
 0x32a   :  { %v554_v30 = vpop.eup %553  ;;  %v304_v31 = vadd.f32 1e-05, %v302_v29 }
 0x32b   :  { %v306_v32 = vmul.f32 %v554_v30, %v303_v25  ;;  %vm312_vm7 = vweird.f32 %v554_v30 }
 0x32c   :  { %555 = vrsqrt.f32 %v304_v31  ;;  %vm313_vm9 = vmor %vm311_vm8, %vm312_vm7  ;;  %vm321_vm11 = vweird.f32 %v304_v31 }
 0x32d   :  { %v307_v33 = vmul.f32 %v554_v30, %v306_v32 }
 0x32f   :  { %v308_v34 = vmul.f32 0.5, %v307_v33 }
 0x331   :  { %v309_v35 = vsub.f32 1.5, %v308_v34 }
 0x332   :  { %v556_v36 = vpop.eup %555 }
 0x333   :  { %v310_v37 = vmul.f32 %v554_v30, %v309_v35  ;;  %v316_v38 = vmul.f32 %v556_v36, %v304_v31  ;;  %vm322_vm10 = vweird.f32 %v556_v36 }
 0x334   :  { %vm323_vm12 = vmor %vm321_vm11, %vm322_vm10 }
 0x335   :  { %v317_v40 = vmul.f32 %v556_v36, %v316_v38  ;;  %v314_v41 = vsel %vm313_vm9, %v554_v30, %v310_v37 }
 0x336   :  { %v328_v43 = vmul.f32 %v546_v39, %v314_v41 }
 0x337   :  { %v318_v42 = vmul.f32 0.5, %v317_v40 }
 0x338   :  { %v330_v46 = vmul.f32 %v328_v43, %v287_v5 }
 0x339   :  { %v319_v44 = vsub.f32 1.5, %v318_v42 }
 0x33a   :  { %v335_v51 = vadd.f32 %v547_v47, %v330_v46 }
 0x33b   :  { %v320_v45 = vmul.f32 %v556_v36, %v319_v44 }
 0x33c   :  { %v337_v53 = vmax.f32 %v335_v51, 0.0 }
 0x33d   :  { %v324_v48 = vsel %vm323_vm12, %v556_v36, %v320_v45 }
 0x33e   :  { %v329_v49 = vmul.f32 %v546_v39, %v324_v48 }
 0x340   :  { %v331_v50 = vmul.f32 %v329_v49, %v288_v9 }
 0x342   :  { %v336_v52 = vadd.f32 %v547_v47, %v331_v50 }
 0x344   :  { %v338_v54 = vmax.f32 %v336_v52, 0.0 }
 0x346   :  { %v356_v55 = vpack.c.bf16 %v338_v54, %v337_v53 }
 0x348   :  { %416 = vmatmul.bf16.vlgmr.msra.gmra.mxu2 %v356_v55 }
 0x3cb   :  { %v417_v57 = vpop.f32.mrf.mxu2 }
 0x3cc   :  { %v418_v58 = vadd.f32 %v548_v56, %v417_v57 }
 0x3ce   :  { %557 = vtanh.f32 %v418_v58 }
 0x3d3   :  { %v419_v59 = vpop.f32.mrf.mxu2 }
 0x3d4   :  { %v558_v60 = vpop.eup %557  ;;  %v420_v61 = vadd.f32 %v548_v56, %v419_v59 }
 0x3d5   :  { %424 = vst [vmem:[#allocation10] sm:$0xff] %v558_v60 }
 0x3d6   :  { %559 = vtanh.f32 %v420_v61 }
 0x3dc   :  { %v560_v62 = vpop.eup %559 }
 0x3dd   :  { %425 = vst [vmem:[#allocation10 + $0x8] sm:$0xff] %v560_v62 }
 0x3de   :  { %438 = dma.vmem_to_hbm [thread:$0]  %s431_s27, 256, %s433_s12, [#allocation4], %s693_s29, %s693_s29, %s694_s30  }
 0x3df   :  { %687 = dma.done.wait [#allocation4], 256  }
 0x3e0   :  { %688 = vsyncadd [#allocation4], 4294967040 }
 0x3e1   :  { %443 = vsyncpa [#allocation3], 1 }
 0x3e2   :  { %444 = vsyncpa [#allocation6], 1 }
 0x3e3   :  { %445 = vsyncpa [#allocation9], 1 }
 0x3e4   :  { %446 = vsyncpa [#allocation4], 1 }

</bundles_post_ra>
